<compile_context>
chip_gen: v7x
topology: tpu7x:2x2x1
jax: 0.10.0
libtpu: 0.0.40
codegen_flags: <defaults>
</compile_context>

<pallas_src>
import functools

import jax
import jax.numpy as jnp
import numpy as np
from jax.experimental import pallas as pl
from jax.experimental.pallas import tpu as pltpu


def coupling_kernel(
    F_ref, y_ref, mask_ref, omm_ref,
    w1f_ref, w1y_ref, b1_ref,
    w2_ref, b2_ref,
    x_ref, ldj_ref,
):
    F = F_ref[...]           # [TB, Cf]   (input dtype; MXU operand)
    y = y_ref[...]           # [TB, D]
    mask = mask_ref[...]     # [1, D]
    omm = omm_ref[...]       # [1, D]     (1 - mask), precomputed on host

    D = y_ref.shape[1]

    # y1 = y * mask
    y1 = y * mask.astype(y.dtype)

    # Fused first layer of map_s / map_t with the projection folded in:
    #   h = tanh(F @ W1F + y1 @ W1Y + b1')    -> [TB, 2H]   (f32 accumulation)
    h = jnp.tanh(
        jnp.dot(F, w1f_ref[...], preferred_element_type=jnp.float32)
        + jnp.dot(y1, w1y_ref[...], preferred_element_type=jnp.float32)
        + b1_ref[...]
    )

    # Merged second layer (block-diagonal, s-half pre-negated on the host):
    #   st = [neg_s | t]   -> [TB, 2D]
    st = jnp.dot(h.astype(w2_ref.dtype), w2_ref[...],
                 preferred_element_type=jnp.float32) + b2_ref[...]
    neg_s = st[:, :D]        # [TB, D]  (already -s)
    t = st[:, D:]            # [TB, D]

    # x = y1 + (1 - mask) * ((y - t) * exp(-s))     (elementwise in f32)
    y_f = y.astype(jnp.float32)
    y1_f = y1.astype(jnp.float32)
    x = y1_f + omm.astype(jnp.float32) * ((y_f - t) * jnp.exp(neg_s))

    # ldj = (-s).sum(-1)
    ldj = jnp.sum(neg_s, axis=-1, keepdims=True)   # [TB, 1]

    x_ref[...] = x.astype(x_ref.dtype)
    ldj_ref[...] = ldj.astype(ldj_ref.dtype)


def pack_coupling_params(p):
    """Host-side packing: fold projection into layer-1, merge s/t heads."""
    H, D = p["ws2"].shape

    # Fused first layers ([Cf,2H], [P,2H], [1,2H]).
    w1f = jnp.concatenate([p["ws1_F"], p["wt1_F"]], axis=1)
    w1p = jnp.concatenate([p["ws1_P"], p["wt1_P"]], axis=1)
    b1 = jnp.concatenate([p["bs1"], p["bt1"]], axis=1)

    # Fold the (bias-only, activation-free) projection Linear:
    #   proj @ w1p + b1 = (y1 @ wp + bp) @ w1p + b1 = y1 @ (wp @ w1p) + (bp @ w1p + b1)
    w1y = p["wp"] @ w1p                        # [D, 2H]
    b1_eff = p["bp"] @ w1p + b1                # [1, 2H]

    # Merged second layer: block-diagonal [2H, 2D], s-half negated so the MXU
    # emits neg_s directly.
    zeros_hd = jnp.zeros((H, D), p["ws2"].dtype)
    w2 = jnp.concatenate(
        [jnp.concatenate([-p["ws2"], zeros_hd], axis=1),    # rows 0..H-1
         jnp.concatenate([zeros_hd, p["wt2"]], axis=1)],    # rows H..2H-1
        axis=0,
    )                                                       # [2H, 2D]
    b2 = jnp.concatenate([-p["bs2"], p["bt2"]], axis=1)     # [1, 2D]

    return dict(
        mask=p["mask"],
        one_minus_mask=1.0 - p["mask"],
        w1f=w1f, w1y=w1y, b1=b1_eff,
        w2=w2, b2=b2,
    )


def _choose_batch_tile(B, Cf, D, H, itemsize,
                       *, vmem_budget_bytes=16 * 1024 * 1024, max_tb=8192):
    """Derive the batch tile from a VMEM byte budget (safe on v5e/v6e/v7x)."""
    # Streamed per-row bytes (double-buffered F/y in, x/ldj out) + f32 temps
    # (h [2H], st [2D], x/y f32 copies ~[4D]).
    stream_bytes = 2 * (Cf + 2 * D + 1) * itemsize
    scratch_bytes = 4 * (2 * H + 2 * D + 4 * D)
    bytes_per_row = stream_bytes + scratch_bytes

    tb = min(B, max_tb, max(8, vmem_budget_bytes // bytes_per_row))
    if tb >= B:
        # Single full block is always legal; but when B is large, split into
        # >= 2 steps so v7x's two TensorCores both get work.
        if B >= 2048:
            half = -(-B // 2)                       # ceil(B / 2)
            return max(8, ((half + 7) // 8) * 8)
        return B
    return max(8, (tb // 8) * 8)                    # second-minor dim 8-aligned


@jax.jit
def coupling_layer_forward(F, y, packed):
    """Forward pass of CouplingLayer: returns (x [B, D], ldj [B])."""
    B, D = y.shape
    Cf = F.shape[1]
    H2 = packed["w1f"].shape[1]                     # = 2H

    tb = _choose_batch_tile(B, Cf, D, H2 // 2, max(y.dtype.itemsize, F.dtype.itemsize))
    grid = (pl.cdiv(B, tb),)

    def batch_spec(cols):
        return pl.BlockSpec((tb, cols), lambda i: (i, 0))

    def resident_spec(arr):
        # Full-array block, same block index every grid step -> stays in VMEM.
        return pl.BlockSpec(arr.shape, lambda i: (0, 0))

    args = (
        F, y, packed["mask"], packed["one_minus_mask"],
        packed["w1f"], packed["w1y"], packed["b1"],
        packed["w2"], packed["b2"],
    )
    in_specs = [batch_spec(Cf), batch_spec(D)] + [resident_spec(a) for a in args[2:]]

    x, ldj = pl.pallas_call(
        coupling_kernel,
        out_shape=(
            jax.ShapeDtypeStruct((B, D), y.dtype),
            jax.ShapeDtypeStruct((B, 1), jnp.float32),
        ),
        grid=grid,
        in_specs=in_specs,
        out_specs=(batch_spec(D), batch_spec(1)),
        compiler_params=pltpu.CompilerParams(
            dimension_semantics=("parallel",),        # v7x: shard batch over 2 TCs
            vmem_limit_bytes=48 * 1024 * 1024,        # tile budget (16 MiB) << limit
        ),
    )(*args)
    return x, ldj[:, 0]


def _reference_forward(F, y, p):
    """Pure-JAX reference of the PyTorch forward (unpacked params)."""
    y1 = y * p["mask"]
    proj = y1 @ p["wp"] + p["bp"]
    h_s = jnp.tanh(F @ p["ws1_F"] + proj @ p["ws1_P"] + p["bs1"])
    s = h_s @ p["ws2"] + p["bs2"]
    h_t = jnp.tanh(F @ p["wt1_F"] + proj @ p["wt1_P"] + p["bt1"])
    t = h_t @ p["wt2"] + p["bt2"]
    x = y1 + (1.0 - p["mask"]) * ((y - t) * jnp.exp(-s))
    return x, jnp.sum(-s, axis=-1)


if __name__ == "__main__":
    key = jax.random.PRNGKey(0)
    B, Cf, D, P, H = 16, 32, 8, 16, 32

    ks = jax.random.split(key, 16)
    F = jax.random.normal(ks[0], (B, Cf), jnp.float32)
    y = jax.random.normal(ks[1], (B, D), jnp.float32)

    # Alternating binary mask over the coordinate dim (register_buffer 'mask')
    mask = (jnp.arange(D) % 2).astype(jnp.float32).reshape(1, D)

    def lin(kw, kb, fan_in, fan_out):
        bound = 1.0 / np.sqrt(fan_in)
        w = jax.random.uniform(kw, (fan_in, fan_out), jnp.float32, -bound, bound)
        b = jax.random.uniform(kb, (1, fan_out), jnp.float32, -bound, bound)
        return w, b

    wp, bp = lin(ks[2], ks[3], D, P)
    ws1, bs1 = lin(ks[4], ks[5], Cf + P, H)
    ws2, bs2 = lin(ks[6], ks[7], H, D)
    wt1, bt1 = lin(ks[8], ks[9], Cf + P, H)
    wt2, bt2 = lin(ks[10], ks[11], H, D)

    params = dict(
        mask=mask,
        wp=wp, bp=bp,
        ws1_F=ws1[:Cf], ws1_P=ws1[Cf:], bs1=bs1, ws2=ws2, bs2=bs2,
        wt1_F=wt1[:Cf], wt1_P=wt1[Cf:], bt1=bt1, wt2=wt2, bt2=bt2,
    )
    packed = pack_coupling_params(params)

    x, ldj = coupling_layer_forward(F, y, packed)
    jax.block_until_ready((x, ldj))

    x_ref, ldj_ref = _reference_forward(F, y, params)
    assert np.allclose(np.asarray(x), np.asarray(x_ref), atol=2e-5, rtol=1e-4)
    assert np.allclose(np.asarray(ldj), np.asarray(ldj_ref), atol=2e-5, rtol=1e-4)

    print("KERNEL_OK")
</pallas_src>

<mosaic_0001>
module attributes {stable_mosaic.version = 11 : i64} {
  func.func @coupling_kernel(%arg0: i32, %arg1: memref<16x32xf32, #tpu.memory_space<vmem>>, %arg2: memref<16x8xf32, #tpu.memory_space<vmem>>, %arg3: memref<1x8xf32, #tpu.memory_space<vmem>>, %arg4: memref<1x8xf32, #tpu.memory_space<vmem>>, %arg5: memref<32x64xf32, #tpu.memory_space<vmem>>, %arg6: memref<8x64xf32, #tpu.memory_space<vmem>>, %arg7: memref<1x64xf32, #tpu.memory_space<vmem>>, %arg8: memref<64x16xf32, #tpu.memory_space<vmem>>, %arg9: memref<1x16xf32, #tpu.memory_space<vmem>>, %arg10: memref<16x8xf32, #tpu.memory_space<vmem>>, %arg11: memref<16x1xf32, #tpu.memory_space<vmem>>) attributes {dimension_semantics = [#tpu.dimension_semantics<parallel>], iteration_bounds = array<i64: 1>, scalar_prefetch = 0 : i64, scratch_operands = 0 : i64, tpu.core_type = #tpu.core_type<tc>, window_params = [{transform_indices = @transform_0, window_bounds = array<i64: 16, 32>}, {transform_indices = @transform_1, window_bounds = array<i64: 16, 8>}, {pipeline_mode = #tpu.pipeline_mode<synchronous>, transform_indices = @transform_2, window_bounds = array<i64: 1, 8>}, {pipeline_mode = #tpu.pipeline_mode<synchronous>, transform_indices = @transform_3, window_bounds = array<i64: 1, 8>}, {pipeline_mode = #tpu.pipeline_mode<synchronous>, transform_indices = @transform_4, window_bounds = array<i64: 32, 64>}, {pipeline_mode = #tpu.pipeline_mode<synchronous>, transform_indices = @transform_5, window_bounds = array<i64: 8, 64>}, {pipeline_mode = #tpu.pipeline_mode<synchronous>, transform_indices = @transform_6, window_bounds = array<i64: 1, 64>}, {pipeline_mode = #tpu.pipeline_mode<synchronous>, transform_indices = @transform_7, window_bounds = array<i64: 64, 16>}, {pipeline_mode = #tpu.pipeline_mode<synchronous>, transform_indices = @transform_8, window_bounds = array<i64: 1, 16>}, {transform_indices = @transform_9, window_bounds = array<i64: 16, 8>}, {transform_indices = @transform_10, window_bounds = array<i64: 16, 1>}]} {
    %c0 = arith.constant 0 : index
    %c0_0 = arith.constant 0 : index
    %0 = vector.load %arg1[%c0, %c0_0] : memref<16x32xf32, #tpu.memory_space<vmem>>, vector<16x32xf32>
    %c0_1 = arith.constant 0 : index
    %c0_2 = arith.constant 0 : index
    %1 = vector.load %arg2[%c0_1, %c0_2] : memref<16x8xf32, #tpu.memory_space<vmem>>, vector<16x8xf32>
    %c0_3 = arith.constant 0 : index
    %c0_4 = arith.constant 0 : index
    %2 = vector.load %arg3[%c0_3, %c0_4] : memref<1x8xf32, #tpu.memory_space<vmem>>, vector<1x8xf32>
    %c0_5 = arith.constant 0 : index
    %c0_6 = arith.constant 0 : index
    %3 = vector.load %arg4[%c0_5, %c0_6] : memref<1x8xf32, #tpu.memory_space<vmem>>, vector<1x8xf32>
    %4 = vector.broadcast %2 : vector<1x8xf32> to vector<16x8xf32>
    %5 = arith.mulf %1, %4 : vector<16x8xf32>
    %c0_7 = arith.constant 0 : index
    %c0_8 = arith.constant 0 : index
    %6 = vector.load %arg5[%c0_7, %c0_8] : memref<32x64xf32, #tpu.memory_space<vmem>>, vector<32x64xf32>
    %cst = arith.constant dense<0.000000e+00> : vector<16x64xf32>
    %7 = tpu.matmul %0, %6, %cst {dimension_numbers = #tpu.dot_dimension_numbers<[1], [0], [0], [1], [0, 0, 1, 1], [], []>} : vector<16x32xf32>, vector<32x64xf32>, vector<16x64xf32> -> vector<16x64xf32>
    %c0_9 = arith.constant 0 : index
    %c0_10 = arith.constant 0 : index
    %8 = vector.load %arg6[%c0_9, %c0_10] : memref<8x64xf32, #tpu.memory_space<vmem>>, vector<8x64xf32>
    %cst_11 = arith.constant dense<0.000000e+00> : vector<16x64xf32>
    %9 = tpu.matmul %5, %8, %cst_11 {dimension_numbers = #tpu.dot_dimension_numbers<[1], [0], [0], [1], [0, 0, 1, 1], [], []>} : vector<16x8xf32>, vector<8x64xf32>, vector<16x64xf32> -> vector<16x64xf32>
    %10 = arith.addf %7, %9 : vector<16x64xf32>
    %c0_12 = arith.constant 0 : index
    %c0_13 = arith.constant 0 : index
    %11 = vector.load %arg7[%c0_12, %c0_13] : memref<1x64xf32, #tpu.memory_space<vmem>>, vector<1x64xf32>
    %12 = vector.broadcast %11 : vector<1x64xf32> to vector<16x64xf32>
    %13 = arith.addf %10, %12 : vector<16x64xf32>
    %14 = math.tanh %13 : vector<16x64xf32>
    %c0_14 = arith.constant 0 : index
    %c0_15 = arith.constant 0 : index
    %15 = vector.load %arg8[%c0_14, %c0_15] : memref<64x16xf32, #tpu.memory_space<vmem>>, vector<64x16xf32>
    %cst_16 = arith.constant dense<0.000000e+00> : vector<16x16xf32>
    %16 = tpu.matmul %14, %15, %cst_16 {dimension_numbers = #tpu.dot_dimension_numbers<[1], [0], [0], [1], [0, 0, 1, 1], [], []>} : vector<16x64xf32>, vector<64x16xf32>, vector<16x16xf32> -> vector<16x16xf32>
    %c0_17 = arith.constant 0 : index
    %c0_18 = arith.constant 0 : index
    %17 = vector.load %arg9[%c0_17, %c0_18] : memref<1x16xf32, #tpu.memory_space<vmem>>, vector<1x16xf32>
    %18 = vector.broadcast %17 : vector<1x16xf32> to vector<16x16xf32>
    %19 = arith.addf %16, %18 : vector<16x16xf32>
    %20 = vector.extract_strided_slice %19 {offsets = [0, 0], sizes = [16, 8], strides = [1, 1]} : vector<16x16xf32> to vector<16x8xf32>
    %21 = vector.extract_strided_slice %19 {offsets = [0, 8], sizes = [16, 8], strides = [1, 1]} : vector<16x16xf32> to vector<16x8xf32>
    %22 = arith.subf %1, %21 : vector<16x8xf32>
    %23 = math.exp %20 : vector<16x8xf32>
    %24 = arith.mulf %22, %23 : vector<16x8xf32>
    %25 = vector.broadcast %3 : vector<1x8xf32> to vector<16x8xf32>
    %26 = arith.mulf %25, %24 : vector<16x8xf32>
    %27 = arith.addf %5, %26 : vector<16x8xf32>
    %cst_19 = arith.constant dense<0.000000e+00> : vector<16xf32>
    %28 = vector.multi_reduction <add>, %20, %cst_19 [1] : vector<16x8xf32> to vector<16xf32>
    %29 = vector.shape_cast %28 : vector<16xf32> to vector<16x1xf32>
    %c0_20 = arith.constant 0 : index
    %c0_21 = arith.constant 0 : index
    %30 = vector.load %arg10[%c0_20, %c0_21] : memref<16x8xf32, #tpu.memory_space<vmem>>, vector<16x8xf32>
    tpu.vector_store %arg10[%c0_20, %c0_21], %27 {strides = array<i32>} : memref<16x8xf32, #tpu.memory_space<vmem>>, vector<16x8xf32>,
    %c0_22 = arith.constant 0 : index
    %c0_23 = arith.constant 0 : index
    %31 = vector.load %arg11[%c0_22, %c0_23] : memref<16x1xf32, #tpu.memory_space<vmem>>, vector<16x1xf32>
    tpu.vector_store %arg11[%c0_22, %c0_23], %29 {strides = array<i32>} : memref<16x1xf32, #tpu.memory_space<vmem>>, vector<16x1xf32>,
    return
  }
  func.func @transform_0(%arg0: i32) -> (i32, i32) {
    %c0_i32 = arith.constant 0 : i32
    %c0_i32_0 = arith.constant 0 : i32
    return %arg0, %c0_i32 : i32, i32
  }
  func.func @transform_1(%arg0: i32) -> (i32, i32) {
    %c0_i32 = arith.constant 0 : i32
    %c0_i32_0 = arith.constant 0 : i32
    return %arg0, %c0_i32 : i32, i32
  }
  func.func @transform_2(%arg0: i32) -> (i32, i32) {
    %c0_i32 = arith.constant 0 : i32
    %c0_i32_0 = arith.constant 0 : i32
    %c0_i32_1 = arith.constant 0 : i32
    return %c0_i32, %c0_i32_0 : i32, i32
  }
  func.func @transform_3(%arg0: i32) -> (i32, i32) {
    %c0_i32 = arith.constant 0 : i32
    %c0_i32_0 = arith.constant 0 : i32
    %c0_i32_1 = arith.constant 0 : i32
    return %c0_i32, %c0_i32_0 : i32, i32
  }
  func.func @transform_4(%arg0: i32) -> (i32, i32) {
    %c0_i32 = arith.constant 0 : i32
    %c0_i32_0 = arith.constant 0 : i32
    %c0_i32_1 = arith.constant 0 : i32
    return %c0_i32, %c0_i32_0 : i32, i32
  }
  func.func @transform_5(%arg0: i32) -> (i32, i32) {
    %c0_i32 = arith.constant 0 : i32
    %c0_i32_0 = arith.constant 0 : i32
    %c0_i32_1 = arith.constant 0 : i32
    return %c0_i32, %c0_i32_0 : i32, i32
  }
  func.func @transform_6(%arg0: i32) -> (i32, i32) {
    %c0_i32 = arith.constant 0 : i32
    %c0_i32_0 = arith.constant 0 : i32
    %c0_i32_1 = arith.constant 0 : i32
    return %c0_i32, %c0_i32_0 : i32, i32
  }
  func.func @transform_7(%arg0: i32) -> (i32, i32) {
    %c0_i32 = arith.constant 0 : i32
    %c0_i32_0 = arith.constant 0 : i32
    %c0_i32_1 = arith.constant 0 : i32
    return %c0_i32, %c0_i32_0 : i32, i32
  }
  func.func @transform_8(%arg0: i32) -> (i32, i32) {
    %c0_i32 = arith.constant 0 : i32
    %c0_i32_0 = arith.constant 0 : i32
    %c0_i32_1 = arith.constant 0 : i32
    return %c0_i32, %c0_i32_0 : i32, i32
  }
  func.func @transform_9(%arg0: i32) -> (i32, i32) {
    %c0_i32 = arith.constant 0 : i32
    %c0_i32_0 = arith.constant 0 : i32
    return %arg0, %c0_i32 : i32, i32
  }
  func.func @transform_10(%arg0: i32) -> (i32, i32) {
    %c0_i32 = arith.constant 0 : i32
    %c0_i32_0 = arith.constant 0 : i32
    return %arg0, %c0_i32 : i32, i32
  }
}

</mosaic_0001>

<bundles_post_ra>
// kernel: coupling_layer_forward.1
= control target key start
LH: loop header
LB: loop body
LE: loop exit
PB: predicated region body
PF: predicated region fallthrough
CT: control target
= control target key end

     0   :  { %vm53_vm0 = vcmask 64512   ;;  %vm135_vm1 = vcmask 261120   ;;  %vm243_vm2 = vcmask 523264   ;;  %vm359_vm3 = vcmask 7168   ;;  %s622_s5 = inlined_call_operand.vmem [shape: f32[8,64], index: 5, kind: input, shape index: {}]   ;;  %s623_s1 = inlined_call_operand.vmem [shape: f32[16,8], index: 1, kind: input, shape index: {}]   ;;  %s624_s2 = inlined_call_operand.vmem [shape: f32[1,8], index: 2, kind: input, shape index: {}]   ;;  %s625_s4 = inlined_call_operand.vmem [shape: f32[32,64], index: 4, kind: input, shape index: {}]   ;;  %s626_s0 = inlined_call_operand.vmem [shape: f32[16,32], index: 0, kind: input, shape index: {}]   ;;  %s627_s7 = inlined_call_operand.vmem [shape: f32[64,16], index: 7, kind: input, shape index: {}]   ;;  %s628_s6 = inlined_call_operand.vmem [shape: f32[1,64], index: 6, kind: input, shape index: {}]   ;;  %s629_s8 = inlined_call_operand.vmem [shape: f32[1,16], index: 8, kind: input, shape index: {}]   ;;  %s630_s3 = inlined_call_operand.vmem [shape: f32[1,8], index: 3, kind: input, shape index: {}]   ;;  %s631_s9 = inlined_call_operand.vmem [shape: f32[16,8], index: 9, kind: output, shape index: {0}]   ;;  %s632_s10 = inlined_call_operand.vmem [shape: f32[16,1], index: 10, kind: output, shape index: {1}]  }
   0x1   :  { %v52_v0 = vld [vmem:[%s622_s5] sm:$0xff]  ;;  %v536_v2 = vld [vmem:[%s623_s1 + $0x8] sm:$0xff]  ;;  %v50_v9 = vld [vmem:[%s625_s4 + $0x10] sm:$0xff] }
   0x2   :  { %v531_v1 = vld [vmem:[%s623_s1] sm:$0xff]  ;;  %399 = vmatprep.subr.mxu0 %v52_v0  ;;  %v49_v5 = vld [vmem:[%s625_s4 + $0x8] sm:$0xff]  ;;  %v51_v10 = vld [vmem:[%s625_s4 + $0x18] sm:$0xff] }
   0x3   :  { %v370_v3 = vld [vmem:[%s624_s2] ss:$0 sm:$0xff]  ;;  %400 = vmatpush3.msra.mxu0 %v52_v0  ;;  %v438_v11 = vpack.c.bf16 %v51_v10, %v50_v9  ;;  %v35_v13 = vld [vmem:[%s626_s0 + $0x8] sm:$0xff]  ;;  %v230_v17 = vld [vmem:[%s627_s7 + $0x10] sm:$0xff] }
   0x4   :  { %v48_v4 = vld [vmem:[%s625_s4] sm:$0xff]  ;;  %v548_v6 = vmul.f32 %v370_v3, %v531_v1  ;;  %v551_v7 = vmul.f32 %v370_v3, %v536_v2  ;;  %v229_v15 = vld [vmem:[%s627_s7 + $0x8] sm:$0xff]  ;;  %v231_v18 = vld [vmem:[%s627_s7 + $0x18] sm:$0xff] }
   0x5   :  { %v434_v8 = vpack.c.bf16 %v49_v5, %v48_v4  ;;  %v34_v12 = vld [vmem:[%s626_s0] sm:$0xff]  ;;  %v446_v19 = vpack.c.bf16 %v231_v18, %v230_v17  ;;  %v233_v21 = vld [vmem:[%s627_s7 + $0x28] sm:$0xff]  ;;  %v234_v22 = vld [vmem:[%s627_s7 + $0x30] sm:$0xff] }
   0x6   :  { %401 = vmatprep.mubr.msk.f32.mxu0 %vm53_vm0, %v548_v6  ;;  %v228_v14 = vld [vmem:[%s627_s7] sm:$0xff]  ;;  %v235_v24 = vld [vmem:[%s627_s7 + $0x38] sm:$0xff] }
   0x7   :  { %435 = vmatprep.subr.bf16.mxu0 %v434_v8  ;;  %402 = vmatmul.mubr.msk.f32.vlgmr.msra.gmra.mrb[0].mxu0 %vm53_vm0, %v551_v7  ;;  %v442_v16 = vpack.c.bf16 %v229_v15, %v228_v14  ;;  %v232_v20 = vld [vmem:[%s627_s7 + $0x20] sm:$0xff]  ;;  %v454_v25 = vpack.c.bf16 %v235_v24, %v234_v22 }
   0x8   :  { %437 = vmatpush3.bf16.msra.mxu0 %v434_v8  ;;  %412 = vmatprep.mubr.msk.f32.mxu0 %vm135_vm1, %v34_v12  ;;  %v450_v23 = vpack.c.bf16 %v233_v21, %v232_v20  ;;  %v375_v26 = vld [vmem:[%s628_s6] ss:$0 sm:$0xff]  ;;  %s469_s6 = smov 120  }
   0x9   :  { %439 = vmatprep.subr.bf16.mxu0 %v438_v11  ;;  %443 = vmatprep.subr.bf16.mxu1 %v442_v16  ;;  %v376_v33 = vld [vmem:[%s629_s8] ss:$0 sm:$0xff] }
   0xa   :  { %445 = vmatpush3.bf16.msra.mxu1 %v442_v16  ;;  %v379_v45 = vld [vmem:[%s630_s3] ss:$0 sm:$0xff] }
   0xb   :  { %447 = vmatprep.subr.bf16.mxu1 %v446_v19 }
   0xc   :  { %441 = vmatpush3.bf16.msra.mxu0 %v438_v11 }
   0xe   :  { %449 = vmatpush3.bf16.msra.mxu1 %v446_v19 }
   0xf   :  { %413 = vmatmul.mubr.msk.f32.vlgmr.msra.gmra.mrb[0].mxu0 %vm135_vm1, %v35_v13  ;;  %451 = vmatprep.subr.bf16.mxu1 %v450_v23 }
  0x12   :  { %453 = vmatpush3.bf16.msra.mxu1 %v450_v23 }
  0x13   :  { %455 = vmatprep.subr.bf16.mxu1 %v454_v25 }
  0x16   :  { %457 = vmatpush3.bf16.msra.mxu1 %v454_v25 }
  0xe2   :  { %v414_v27 = vpop.f32.mrb[0].mxu0 }
  0xe3   :  { %v225_v28 = vadd.f32 %v414_v27, %v375_v26  ;;  %v208_v29 = vpop.f32.mrb[1].mxu0 }
  0xe4   :  { %v224_v30 = vadd.f32 %v375_v26, %v208_v29 }
  0xe6   :  { %461 = vtanh.f32 %v224_v30 }
  0xe7   :  { %463 = vtanh.f32 %v225_v28 }
  0xf0   :  { %v462_v31 = vpop.eup %461 }
  0xf1   :  { %v464_v32 = vpop.eup %463  ;;  %431 = vmatprep.mubr.msk.f32.mxu1 %vm243_vm2, %v462_v31 }
  0xf2   :  { %432 = vmatmul.mubr.msk.f32.vlgmr.msra.gmra.mrb[0].mxu1 %vm243_vm2, %v464_v32 }
 0x1c5   :  { %v433_v34 = vpop.f32.mrb[0].mxu1 }
 0x1c6   :  { %v316_v35 = vpop.f32.mrb[1].mxu1  ;;  %v322_v37 = vadd.f32 %v433_v34, %v376_v33 }
 0x1c7   :  { %v317_v36 = vadd.f32 %v376_v33, %v316_v35 }
 0x1c8   :  { %v354_v39 = vsel %vm53_vm0, %v322_v37, 0.0  ;;  %v337_v41 = vmul.f32 1.442695, %v322_v37 }
 0x1c9   :  { %327 = vrot.lane.b32.xlu1 %v317_v36, %s469_s6  ;;  %v351_v38 = vsel %vm53_vm0, %v317_v36, 0.0  ;;  %v335_v40 = vmul.f32 1.442695, %v317_v36 }
 0x1ca   :  { %352 = vadd.xlane.f32.xlu0 %v351_v38 }
 0x1cb   :  { %465 = vpow2.f32 %v335_v40 }
 0x1cc   :  { %467 = vpow2.f32 %v337_v41 }
 0x1cd   :  { %329 = vrot.lane.b32.xlu1 %v322_v37, %s469_s6 }
 0x1ce   :  { %355 = vadd.xlane.f32.xlu0 %v354_v39 }
 0x1d5   :  { %v466_v44 = vpop.eup %465 }
 0x1d6   :  { %v468_v50 = vpop.eup %467 }
 0x23b   :  { %v328_v42 = vpop.permute.xlu1 %327 }
 0x23c   :  { %v333_v43 = vsub.f32 %v531_v1, %v328_v42 }
 0x23e   :  { %v339_v46 = vmul.f32 %v466_v44, %v333_v43 }
 0x23f   :  { %v330_v47 = vpop.permute.xlu1 %329 }
 0x240   :  { %v347_v48 = vmul.f32 %v379_v45, %v339_v46  ;;  %v334_v49 = vsub.f32 %v536_v2, %v330_v47 }
 0x242   :  { %v349_v51 = vadd.f32 %v347_v48, %v548_v6  ;;  %v340_v52 = vmul.f32 %v468_v50, %v334_v49 }
 0x244   :  { %357 = vst.msk [vmem:[%s631_s9] sm:$0xff] %vm53_vm0, %v349_v51  ;;  %v348_v53 = vmul.f32 %v379_v45, %v340_v52 }
 0x246   :  { %v350_v54 = vadd.f32 %v348_v53, %v551_v7 }
 0x248   :  { %358 = vst.msk [vmem:[%s631_s9 + $0x8] sm:$0xff] %vm53_vm0, %v350_v54 }
 0x257   :  { %v353_v55 = vpop.xlane.xlu0 %352 }
 0x258   :  { %360 = vst.msk [vmem:[%s632_s10] sm:$0xff] %vm359_vm3, %v353_v55 }
 0x25b   :  { %v356_v56 = vpop.xlane.xlu0 %355 }
 0x25c   :  { %361 = vst.msk [vmem:[%s632_s10 + $0x8] sm:$0xff] %vm359_vm3, %v356_v56 }

</bundles_post_ra>
